<compile_context>
chip_gen: v7x
topology: tpu7x:2x2x1
jax: 0.10.0
libtpu: 0.0.40
codegen_flags: <defaults>
</compile_context>

<pallas_src>
import functools

import jax
import jax.numpy as jnp
from jax.experimental import pallas as pl
from jax.experimental.pallas import tpu as pltpu


def _moving_avg_kernel(x_ref, out_ref, *, kernel_size, seq_len, out_len):
    """x_ref: (L, nc) VMEM tile; out_ref: (out_len, nc). nc = lane-dense B*C block."""
    half = (kernel_size - 1) // 2
    nc = x_ref.shape[1]

    # Load the tile once and upcast once (single astype, not per-slice).
    x = x_ref[...].astype(jnp.float32)                       # (L, nc)

    # Edge-replication padding done in-register; no HBM xpad materialization.
    if half > 0:
        front = jnp.broadcast_to(x[0:1, :], (half, nc))
        end = jnp.broadcast_to(x[seq_len - 1:seq_len, :], (half, nc))
        xp = jnp.concatenate([front, x, end], axis=0)        # (L + 2*half, nc)
    else:
        xp = x

    # log2(k) doubling tree of windowed partial sums:
    #   S_w[i] = sum_{j<w} xp[i+j];   S_{2w}[i] = S_w[i] + S_w[i+w]
    sums = {1: xp}
    cur, w = xp, 1
    while 2 * w <= kernel_size:
        n = cur.shape[0] - w
        cur = cur[:n] + cur[w:]
        w *= 2
        sums[w] = cur

    # Combine the binary decomposition of kernel_size.
    acc = None
    off, rem = 0, kernel_size
    for width in sorted(sums.keys(), reverse=True):
        if rem >= width:
            part = sums[width][off:off + out_len]
            acc = part if acc is None else acc + part
            off += width
            rem -= width

    mean = acc / jnp.float32(kernel_size)   # divide (not *1/k) for AvgPool parity
    out_ref[...] = mean.astype(out_ref.dtype)


def moving_avg(x, kernel_size, stride=1):
    """Pallas equivalent of PatchTST moving_avg.forward; x: [B, L, C]."""
    assert kernel_size >= 1
    B, L, C = x.shape
    half = (kernel_size - 1) // 2
    out_len = L + 2 * half - kernel_size + 1      # == L for odd kernel_size
    assert out_len >= 1, "sequence too short for this kernel_size"
    NC = B * C

    # Lane-dense layout: [L, B*C]  (layout plumbing only; compute is in-kernel).
    xt = jnp.transpose(x, (1, 0, 2)).reshape(L, NC)

    # Lane block: always a multiple of 128 (unmasked lane-dense stores), sized
    # toward ~2 MiB of f32 per input tile for DMA/compute overlap.
    lane = 128
    target = max(lane, ((2 * 1024 * 1024) // (L * 4)) // lane * lane)
    nc_pad = ((NC + lane - 1) // lane) * lane
    nc_block = min(target, nc_pad)
    nc_pad = ((nc_pad + nc_block - 1) // nc_block) * nc_block
    if nc_pad != NC:
        xt = jnp.pad(xt, ((0, 0), (0, nc_pad - NC)))

    grid = (nc_pad // nc_block,)
    kernel = functools.partial(
        _moving_avg_kernel, kernel_size=kernel_size, seq_len=L, out_len=out_len)

    out_t = pl.pallas_call(
        kernel,
        out_shape=jax.ShapeDtypeStruct((out_len, nc_pad), x.dtype),
        grid_spec=pltpu.PrefetchScalarGridSpec(
            num_scalar_prefetch=0,
            grid=grid,
            in_specs=[pl.BlockSpec((L, nc_block), lambda i: (0, i))],
            out_specs=pl.BlockSpec((out_len, nc_block), lambda i: (0, i)),
        ),
        compiler_params=pltpu.CompilerParams(
            dimension_semantics=("parallel",),
            vmem_limit_bytes=32 * 1024 * 1024,
        ),
    )(xt)

    out = jnp.transpose(out_t[:, :NC].reshape(out_len, B, C), (1, 0, 2))  # [B, L', C]
    if stride != 1:
        # AvgPool1d with stride s == stride-1 result sampled every s steps.
        out = out[:, ::stride, :]
    return out


def _reference(x, kernel_size, stride=1):
    """Pure-JAX replica of the PyTorch moving_avg forward."""
    half = (kernel_size - 1) // 2
    front = jnp.repeat(x[:, 0:1, :], half, axis=1)
    end = jnp.repeat(x[:, -1:, :], half, axis=1)
    xp = jnp.concatenate([front, x, end], axis=1)
    Lp = xp.shape[1]
    out_len = (Lp - kernel_size) // stride + 1
    windows = jnp.stack(
        [xp[:, i * stride:i * stride + kernel_size, :] for i in range(out_len)],
        axis=1)
    return jnp.mean(windows, axis=2)


if __name__ == "__main__":
    key = jax.random.PRNGKey(0)

    # Small config matching the module's forward: x = [batch, seq_len, channels]
    B, L, C = 2, 16, 8
    kernel_size, stride = 5, 1
    x = jax.random.normal(key, (B, L, C), dtype=jnp.float32)

    out = jax.block_until_ready(moving_avg(x, kernel_size, stride))
    ref = _reference(x, kernel_size, stride)
    assert out.shape == ref.shape
    assert jnp.allclose(out, ref, atol=1e-5, rtol=1e-5)

    # Second config: PatchTST-style kernel_size=25 exercising the log-k tree
    # and the multi-128-lane path.
    B2, L2, C2 = 16, 32, 9
    x2 = jax.random.normal(jax.random.PRNGKey(1), (B2, L2, C2), dtype=jnp.float32)
    out2 = jax.block_until_ready(moving_avg(x2, 25, 1))
    ref2 = _reference(x2, 25, 1)
    assert out2.shape == ref2.shape
    assert jnp.allclose(out2, ref2, atol=1e-5, rtol=1e-5)

    print("KERNEL_OK")
</pallas_src>

<mosaic_0001>
module attributes {stable_mosaic.version = 11 : i64} {
  func.func @_moving_avg_kernel(%arg0: i32, %arg1: memref<16x128xf32, #tpu.memory_space<vmem>>, %arg2: memref<16x128xf32, #tpu.memory_space<vmem>>) attributes {dimension_semantics = [#tpu.dimension_semantics<parallel>], iteration_bounds = array<i64: 1>, scalar_prefetch = 0 : i64, scratch_operands = 0 : i64, tpu.core_type = #tpu.core_type<tc>, window_params = [{transform_indices = @transform_0, window_bounds = array<i64: 16, 128>}, {transform_indices = @transform_1, window_bounds = array<i64: 16, 128>}]} {
    %c0 = arith.constant 0 : index
    %c0_0 = arith.constant 0 : index
    %0 = vector.load %arg1[%c0, %c0_0] : memref<16x128xf32, #tpu.memory_space<vmem>>, vector<16x128xf32>
    %1 = vector.extract_strided_slice %0 {offsets = [0, 0], sizes = [1, 128], strides = [1, 1]} : vector<16x128xf32> to vector<1x128xf32>
    %2 = vector.shape_cast %1 : vector<1x128xf32> to vector<1x128xf32>
    %3 = vector.broadcast %2 : vector<1x128xf32> to vector<2x128xf32>
    %4 = vector.extract_strided_slice %0 {offsets = [15, 0], sizes = [1, 128], strides = [1, 1]} : vector<16x128xf32> to vector<1x128xf32>
    %5 = vector.shape_cast %4 : vector<1x128xf32> to vector<1x128xf32>
    %6 = vector.broadcast %5 : vector<1x128xf32> to vector<2x128xf32>
    %7 = tpu.concatenate %3, %0, %6 in 0 : vector<2x128xf32>, vector<16x128xf32>, vector<2x128xf32> -> vector<20x128xf32>
    %8 = vector.extract_strided_slice %7 {offsets = [0, 0], sizes = [19, 128], strides = [1, 1]} : vector<20x128xf32> to vector<19x128xf32>
    %9 = vector.extract_strided_slice %7 {offsets = [1, 0], sizes = [19, 128], strides = [1, 1]} : vector<20x128xf32> to vector<19x128xf32>
    %10 = arith.addf %8, %9 : vector<19x128xf32>
    %11 = vector.extract_strided_slice %10 {offsets = [0, 0], sizes = [17, 128], strides = [1, 1]} : vector<19x128xf32> to vector<17x128xf32>
    %12 = vector.extract_strided_slice %10 {offsets = [2, 0], sizes = [17, 128], strides = [1, 1]} : vector<19x128xf32> to vector<17x128xf32>
    %13 = arith.addf %11, %12 : vector<17x128xf32>
    %14 = vector.extract_strided_slice %13 {offsets = [0, 0], sizes = [16, 128], strides = [1, 1]} : vector<17x128xf32> to vector<16x128xf32>
    %15 = vector.extract_strided_slice %7 {offsets = [4, 0], sizes = [16, 128], strides = [1, 1]} : vector<20x128xf32> to vector<16x128xf32>
    %16 = arith.addf %14, %15 : vector<16x128xf32>
    %cst = arith.constant 5.000000e+00 : f32
    %17 = vector.broadcast %cst : f32 to vector<16x128xf32>
    %18 = arith.divf %16, %17 : vector<16x128xf32>
    %c0_1 = arith.constant 0 : index
    %c0_2 = arith.constant 0 : index
    %19 = vector.load %arg2[%c0_1, %c0_2] : memref<16x128xf32, #tpu.memory_space<vmem>>, vector<16x128xf32>
    tpu.vector_store %arg2[%c0_1, %c0_2], %18 {strides = array<i32>} : memref<16x128xf32, #tpu.memory_space<vmem>>, vector<16x128xf32>,
    return
  }
  func.func @transform_0(%arg0: i32) -> (i32, i32) {
    %c0_i32 = arith.constant 0 : i32
    %c0_i32_0 = arith.constant 0 : i32
    return %c0_i32, %arg0 : i32, i32
  }
  func.func @transform_1(%arg0: i32) -> (i32, i32) {
    %c0_i32 = arith.constant 0 : i32
    %c0_i32_0 = arith.constant 0 : i32
    return %c0_i32, %arg0 : i32, i32
  }
}

</mosaic_0001>

<bundles_post_ra>
// kernel: tpu_custom_call.1
= control target key start
LH: loop header
LB: loop body
LE: loop exit
PB: predicated region body
PF: predicated region fallthrough
CT: control target
= control target key end

     0   :  { %6 = vsyncpa [#allocation3], 0  ;;  %s199_s0 = inlined_call_operand.hbm [shape: f32[16,128], index: 0, kind: input, shape index: {}]   ;;  %s200_s1 = inlined_call_operand.hbm [shape: f32[16,128], index: 1, kind: output, shape index: {}]  }
   0x1   :  { %7 = vsyncpa [#allocation4], 0  ;;  %s155_s6 = smov [#allocation2]   ;;  %s107_s10 = scalar_lea.hbm %s199_s0, 256 }
   0x2   :  { %s13_s7 = sshll.u32 %s155_s6, 4  ;;  %p108_p0 = scmp.ne.s32.totalorder %s199_s0, %s107_s10  ;;  %s14_s7 = int_to_ptr.vmem [resolvable:$true] %s13_s7 }
   0x3   :  { %p111_p1 = scmp.lt.u32.totalorder %s107_s10, %s199_s0 }
   0x5   :  { %p113_p2 = pnand %p111_p1, %p108_p0 }
   0x7   :  { %116 = shalt.err (!%p113_p2)
}
   0x8   :  { %s117_s15 = scalar_lea.vmem %s14_s7, 256  ;;  %p122_p4 = scmp.lt.s32.totalorder %s14_s7, %s14_s7 }
   0x9   :  { %p118_p3 = scmp.ne.s32.totalorder %s14_s7, %s117_s15  ;;  %p123_p5 = scmp.lt.s32.totalorder %s117_s15, %s117_s15 }
   0xb   :  { %p124_p6 = por %p123_p5, %p122_p4 }
   0xd   :  { %p125_p7 = pnand %p124_p6, %p118_p3 }
   0xf   :  { %128 = shalt.err (!%p125_p7)
}
  0x10   :  { %s156_s16 = smov 128   ;;  %s157_s17 = smov 8  }
  0x11   :  { %19 = dma.hbm_to_vmem [thread:$0]  %s199_s0, 256, %s14_s7, [#allocation3], %s156_s16, %s156_s16, %s157_s17  }
  0x12   :  { %151 = dma.done.wait [#allocation3], 256  }
  0x13   :  { %152 = vsyncadd [#allocation3], 4294967040  ;;  %v25_v0 = vlaneseq  ;;  %v23_v4 = vld [vmem:[#allocation2] sm:$0xff]  ;;  %v24_v5 = vld [vmem:[#allocation2 + $0x8] sm:$0xff]  ;;  %vm35_vm0 = vcmask 1041408   ;;  %vm46_vm1 = vcmask 1046528  }
  0x14   :  { %v36_v8 = vrot.slane %v23_v4, 6  ;;  %v37_v9 = vrot.slane %v24_v5, 6  ;;  %vm61_vm2 = vcmask 1045504   ;;  %vm71_vm3 = vcmask 1043456   ;;  %s158_s0 = smov [#allocation5]  }
  0x15   :  { %v26_v1 = vshrl.u32 %v25_v0, 7  ;;  %s91_s20 = sshll.u32 %s158_s0, 4  ;;  %s92_s20 = int_to_ptr.vmem [resolvable:$true] %s91_s20 }
  0x16   :  { %v38_v10 = vsel %vm35_vm0, %v36_v8, %v37_v9  ;;  %s129_s21 = scalar_lea.vmem %s92_s20, 256  ;;  %p134_p9 = scmp.lt.s32.totalorder %s92_s20, %s92_s20 }
  0x17   :  { %v27_v2 = vsub.s32 0, %v26_v1  ;;  %v31_v3 = vsub.s32 7, %v26_v1  ;;  %v48_v14 = vrot.slane %v38_v10, 1  ;;  %v73_v22 = vrot.slane %v38_v10, 4  ;;  %p130_p8 = scmp.ne.s32.totalorder %s92_s20, %s129_s21  ;;  %p135_p10 = scmp.lt.s32.totalorder %s129_s21, %s129_s21 }
  0x19   :  { %v28_v6 = vrot.slane %v23_v4, %v27_v2  ;;  %v32_v7 = vrot.slane %v24_v5, %v31_v3  ;;  %p136_p11 = por %p135_p10, %p134_p9 }
  0x1b   :  { %v42_v11 = vsel %vm35_vm0, %v28_v6, %v36_v8  ;;  %v43_v12 = vsel %vm35_vm0, %v37_v9, %v32_v7  ;;  %p137_p12 = pnand %p136_p11, %p130_p8 }
  0x1c   :  { %v47_v13 = vrot.slane %v42_v11, 1  ;;  %v50_v15 = vrot.slane %v43_v12, 1  ;;  %v72_v18 = vrot.slane %v42_v11, 4  ;;  %v75_v23 = vrot.slane %v43_v12, 4 }
  0x1e   :  { %v49_v16 = vsel %vm46_vm1, %v47_v13, %v48_v14  ;;  %v51_v17 = vsel %vm46_vm1, %v48_v14, %v50_v15  ;;  %v57_v19 = vadd.f32 %v50_v15, %v43_v12  ;;  %v74_v28 = vsel %vm71_vm3, %v72_v18, %v73_v22 }
  0x1f   :  { %v55_v20 = vadd.f32 %v49_v16, %v42_v11  ;;  %v56_v21 = vadd.f32 %v51_v17, %v38_v10  ;;  %v76_v30 = vsel %vm71_vm3, %v73_v22, %v75_v23 }
  0x20   :  { %v65_v24 = vrot.slane %v57_v19, 2 }
  0x21   :  { %v62_v25 = vrot.slane %v55_v20, 2  ;;  %v63_v26 = vrot.slane %v56_v21, 2 }
  0x23   :  { %v64_v27 = vsel %vm61_vm2, %v62_v25, %v63_v26  ;;  %v66_v29 = vsel %vm61_vm2, %v63_v26, %v65_v24 }
  0x24   :  { %v69_v31 = vadd.f32 %v64_v27, %v55_v20  ;;  %v70_v32 = vadd.f32 %v66_v29, %v56_v21 }
  0x26   :  { %v79_v33 = vadd.f32 %v74_v28, %v69_v31  ;;  %v80_v34 = vadd.f32 %v76_v30, %v70_v32 }
  0x28   :  { %v82_v35 = vmul.f32 0.2, %v79_v33  ;;  %v83_v36 = vmul.f32 0.2, %v80_v34 }
  0x2a   :  { %84 = vst [vmem:[#allocation5] sm:$0xff] %v82_v35  ;;  %85 = vst [vmem:[#allocation5 + $0x8] sm:$0xff] %v83_v36 }
  0x2b   :  { %140 = shalt.err (!%p137_p12)
}
  0x2c   :  { %s141_s24 = scalar_lea.hbm %s200_s1, 256 }
  0x2d   :  { %p142_p13 = scmp.ne.s32.totalorder %s200_s1, %s141_s24  ;;  %p145_p0 = scmp.lt.u32.totalorder %s141_s24, %s200_s1 }
  0x2f   :  { %p147_p1 = pnand %p145_p0, %p142_p13 }
  0x31   :  { %150 = shalt.err (!%p147_p1)
}
  0x32   :  { %97 = dma.vmem_to_hbm [thread:$0]  %s92_s20, 256, %s200_s1, [#allocation4], %s156_s16, %s156_s16, %s157_s17  }
  0x33   :  { %153 = dma.done.wait [#allocation4], 256  }
  0x34   :  { %154 = vsyncadd [#allocation4], 4294967040 }
  0x35   :  { %101 = vsyncpa [#allocation3], 1 }
  0x36   :  { %102 = vsyncpa [#allocation4], 1 }

</bundles_post_ra>
